<compile_context>
chip_gen: v7x
topology: tpu7x:2x2x1
jax: 0.10.0
libtpu: 0.0.40
codegen_flags: <defaults>
</compile_context>

<pallas_src>
import math
import warnings
from typing import List

import jax
import jax.numpy as jnp
from jax import lax
from jax.experimental import pallas as pl
from jax.experimental.pallas import tpu as pltpu


# ----------------------------------------------------------------------------
# Head-slope computation (pure Python, mirrors the PyTorch module exactly).
# ----------------------------------------------------------------------------
def _get_slopes_power_of_2(n: int) -> List[float]:
    start = 2 ** (-(2 ** (-(math.log2(n) - 3))))
    ratio = start
    return [start * ratio**i for i in range(n)]


def get_alibi_head_slopes(num_attention_head: int) -> List[float]:
    if math.log2(num_attention_head).is_integer():
        return _get_slopes_power_of_2(num_attention_head)
    closest_power_of_2 = 2 ** math.floor(math.log2(num_attention_head))
    slopes_a = _get_slopes_power_of_2(closest_power_of_2)
    slopes_b = get_alibi_head_slopes(2 * closest_power_of_2)
    slopes_b = slopes_b[0::2][: num_attention_head - closest_power_of_2]
    return slopes_a + slopes_b


# ----------------------------------------------------------------------------
# Helpers / tuning knobs.
# ----------------------------------------------------------------------------
def _round_up(x: int, m: int) -> int:
    return ((x + m - 1) // m) * m


_TILE_BUDGET_BYTES = 8 * 1024 * 1024     # per output block (8 MiB: good on all gens)
_MIN_SPLIT_TILE_BYTES = 4 * 1024 * 1024  # only force >=2 row-tiles (v7x megacore) if
                                         # tiles stay at least this big
_SMALL_PLANE_BYTES = 2 * 1024 * 1024     # per-head plane <= this -> per-head path
_VMEM_LIMIT_CAP = 48 * 1024 * 1024       # safe even on v7x (64 MiB physical VMEM/TC)


def _pick_row_tiling(d: int, dp_cols: int, itemsize: int, row_mult: int):
    """Returns (dp_rows, tm): padded row count and row-tile size.

    tn is always the full (128-padded) column dim -> each block is a fully
    contiguous HBM region.  tm is a multiple of `row_mult` (sublane count).
    """
    dp_rows = _round_up(max(d, row_mult), row_mult)
    cap = (_TILE_BUDGET_BYTES // (dp_cols * itemsize)) // row_mult * row_mult
    cap = max(row_mult, min(cap, dp_rows))
    # Prefer >=2 row-tiles so v7x's two TensorCores both get work, but only if
    # that keeps blocks >= _MIN_SPLIT_TILE_BYTES (per-step overhead on v5e/v6e).
    half = (dp_rows // 2) // row_mult * row_mult
    if half >= row_mult and half * dp_cols * itemsize >= _MIN_SPLIT_TILE_BYTES:
        cap = min(cap, half)
    # Largest multiple of row_mult <= cap that divides dp_rows.
    tm = row_mult
    t = cap
    while t >= row_mult:
        if dp_rows % t == 0:
            tm = t
            break
        t -= row_mult
    if tm < 64 and dp_rows > 8 * row_mult:
        # Pathological divisor structure: pad rows a bit further instead of
        # taking tiny tiles (padding is never exposed by forward()).
        tm = max(row_mult, (min(cap, 256) // row_mult) * row_mult)
        dp_rows = _round_up(dp_rows, tm)
    return dp_rows, tm


# ----------------------------------------------------------------------------
# Pallas kernels.
# ----------------------------------------------------------------------------
def _alibi_perhead_kernel(slopes_ref, out_ref):
    # Small path. grid = (H,) "parallel"; out_ref is one full (dp_rows, dp_cols)
    # head plane (leading dims squeezed).
    h = pl.program_id(0)
    dr, dc = out_ref.shape
    rows = lax.broadcasted_iota(jnp.int32, (dr, dc), 0)   # target position i
    cols = lax.broadcasted_iota(jnp.int32, (dr, dc), 1)   # source position j
    neg_dist = -jnp.abs(cols - rows).astype(jnp.float32)  # -|i - j|
    out_ref[...] = (slopes_ref[h] * neg_dist).astype(out_ref.dtype)


def _alibi_tiled_kernel(slopes_ref, out_ref, ndist_ref):
    # Tiled path. grid = (row-tile [parallel], head [arbitrary, innermost]).
    # out_ref: (tm, dp_cols) VMEM tile;  ndist_ref: (tm, dp_cols) f32 scratch
    # holding -|i-j| for this row-tile, computed once (head == 0) and reused
    # for all H heads -> per-head work is one scalar-mul + store.
    i = pl.program_id(0)
    h = pl.program_id(1)
    tm, tn = out_ref.shape

    @pl.when(h == 0)
    def _():
        rows = lax.broadcasted_iota(jnp.int32, (tm, tn), 0) + i * tm
        cols = lax.broadcasted_iota(jnp.int32, (tm, tn), 1)
        ndist_ref[...] = -jnp.abs(cols - rows).astype(jnp.float32)

    out_ref[...] = (slopes_ref[h] * ndist_ref[...]).astype(out_ref.dtype)


# ----------------------------------------------------------------------------
# Builder.
# ----------------------------------------------------------------------------
def build_alibi(num_attention_head: int, alibi_dim: int, *,
                dtype=jnp.float32) -> jax.Array:
    """Returns the (row/lane padded) alibi tensor of shape (1, H, Dp_r, Dp_c).

    Rows are padded to a multiple of 8 (f32 sublane), columns to a multiple of
    128 (lane); the padding is never exposed — callers slice [:, :, :S, :S].
    `dtype` defaults to float32 (PyTorch parity); pass jnp.bfloat16 to halve
    the HBM writeback if the consumer takes bf16 bias.
    """
    h = int(num_attention_head)
    d = int(alibi_dim)
    itemsize = jnp.dtype(dtype).itemsize
    row_mult = max(8, 32 // itemsize)          # sublane count for this dtype
    dp_cols = _round_up(max(d, 128), 128)      # lane-dense, unmasked stores

    slopes = jnp.asarray(get_alibi_head_slopes(h), dtype=jnp.float32)

    small_rows = _round_up(max(d, row_mult), row_mult)
    plane_bytes = small_rows * dp_cols * itemsize

    if plane_bytes <= _SMALL_PLANE_BYTES:
        # ---- small path: one program per head, all heads "parallel" --------
        dp_rows = small_rows
        out_shape = jax.ShapeDtypeStruct((1, h, dp_rows, dp_cols), dtype)
        cost = pl.CostEstimate(
            flops=5 * h * dp_rows * dp_cols, transcendentals=0,
            bytes_accessed=h * dp_rows * dp_cols * itemsize + 4 * h)
        return pl.pallas_call(
            _alibi_perhead_kernel,
            out_shape=out_shape,
            grid_spec=pltpu.PrefetchScalarGridSpec(
                num_scalar_prefetch=0,
                grid=(h,),
                in_specs=[pl.BlockSpec(memory_space=pltpu.SMEM)],  # slopes
                out_specs=pl.BlockSpec(
                    (pl.Squeezed(), pl.Squeezed(), dp_rows, dp_cols),
                    lambda hh: (0, hh, 0, 0)),
            ),
            compiler_params=pltpu.CompilerParams(
                dimension_semantics=("parallel",)),
            cost_estimate=cost,
        )(slopes)

    # ---- tiled path: full-row ~8 MiB blocks, head innermost + dist dedup ----
    dp_rows, tm = _pick_row_tiling(d, dp_cols, itemsize, row_mult)
    out_shape = jax.ShapeDtypeStruct((1, h, dp_rows, dp_cols), dtype)
    tile_bytes = tm * dp_cols * itemsize
    scratch_bytes = tm * dp_cols * 4  # f32 neg-dist scratch
    # 2x double-buffered output block + scratch + headroom for elementwise temps.
    vmem_limit = int(min(2 * tile_bytes + scratch_bytes + 16 * 1024 * 1024,
                         _VMEM_LIMIT_CAP))
    cost = pl.CostEstimate(
        flops=dp_rows * dp_cols * (4 + h), transcendentals=0,
        bytes_accessed=h * dp_rows * dp_cols * itemsize + 4 * h)

    return pl.pallas_call(
        _alibi_tiled_kernel,
        out_shape=out_shape,
        grid_spec=pltpu.PrefetchScalarGridSpec(
            num_scalar_prefetch=0,
            grid=(dp_rows // tm, h),
            in_specs=[pl.BlockSpec(memory_space=pltpu.SMEM)],      # slopes
            out_specs=pl.BlockSpec(
                (pl.Squeezed(), pl.Squeezed(), tm, dp_cols),
                lambda i, hh: (0, hh, i, 0)),
            scratch_shapes=[pltpu.VMEM((tm, dp_cols), jnp.float32)],
        ),
        compiler_params=pltpu.CompilerParams(
            dimension_semantics=("parallel", "arbitrary"),
            vmem_limit_bytes=vmem_limit),
        cost_estimate=cost,
    )(slopes)


# ----------------------------------------------------------------------------
# Module wrapper (same forward semantics as the PyTorch `Alibi` module).
# ----------------------------------------------------------------------------
class AlibiPallas:
    """JAX/Pallas equivalent of the PyTorch `Alibi` module."""

    def __init__(self, num_attention_head: int, alibi_dim: int, *,
                 dtype=jnp.float32):
        self.num_attention_head = int(num_attention_head)
        self.alibi_dim = int(alibi_dim)
        self.dtype = dtype
        self.slopes = jnp.asarray(
            get_alibi_head_slopes(self.num_attention_head), dtype=jnp.float32)
        # Padded tensor is cached as-is; forward() does a single combined slice.
        self._alibi_padded = build_alibi(
            self.num_attention_head, self.alibi_dim, dtype=dtype)

    @property
    def alibi(self) -> jax.Array:
        # Parity with the torch (1, H, alibi_dim, alibi_dim) buffer; materialized
        # lazily so the cached tensor stays padded (only one slice ever happens).
        return self._alibi_padded[:, :, : self.alibi_dim, : self.alibi_dim]

    def forward(self, sequence_length: int) -> jax.Array:
        # TODO(synk): Python-side mutation (rebuild-on-demand cache) mirrors the
        # PyTorch module but is not jit/trace-safe; call with concrete ints.
        if self.alibi_dim < sequence_length:
            warnings.warn(
                f"Increasing alibi size from {self.alibi_dim} to {sequence_length}")
            self.alibi_dim = int(sequence_length)
            self._alibi_padded = build_alibi(
                self.num_attention_head, self.alibi_dim, dtype=self.dtype)
        # Single combined slice straight off the padded cache.
        return self._alibi_padded[:, :, :sequence_length, :sequence_length]

    __call__ = forward


# ----------------------------------------------------------------------------
# Pure-JAX reference for verification.
# ----------------------------------------------------------------------------
def alibi_ref(num_attention_head: int, alibi_dim: int) -> jax.Array:
    pos = jnp.arange(alibi_dim)
    dist = jnp.abs(pos[None, :] - pos[:, None]).astype(jnp.float32)  # (D, D)
    slopes = jnp.asarray(
        get_alibi_head_slopes(num_attention_head), dtype=jnp.float32)
    return (slopes[:, None, None] * -dist)[None]  # (1, H, D, D)


if __name__ == "__main__":
    # The module takes no tensor inputs; PRNGKey kept for the deterministic-
    # setup convention.
    _ = jax.random.PRNGKey(0)

    # --- small config: exercises the per-head "small" path --------------------
    NUM_HEADS = 8     # small power-of-2 head count
    ALIBI_DIM = 128   # small alibi_dim
    SEQ_LEN = 64      # forward(sequence_length)

    module = AlibiPallas(NUM_HEADS, ALIBI_DIM)
    out = jax.block_until_ready(module.forward(SEQ_LEN))
    ref = alibi_ref(NUM_HEADS, ALIBI_DIM)[:, :, :SEQ_LEN, :SEQ_LEN]
    assert out.shape == (1, NUM_HEADS, SEQ_LEN, SEQ_LEN), out.shape
    assert out.dtype == jnp.float32
    assert jnp.allclose(out, ref, atol=1e-6, rtol=1e-6)

    # --- larger config: exercises the tiled (row-tile, head) path -------------
    NUM_HEADS2 = 12    # config default num_attention_head (non power of 2)
    ALIBI_DIM2 = 1024  # per-head plane > 2 MiB -> tiled path with dist dedup
    SEQ_LEN2 = 700     # non-aligned slice

    module2 = AlibiPallas(NUM_HEADS2, ALIBI_DIM2)
    out2 = jax.block_until_ready(module2.forward(SEQ_LEN2))
    ref2 = alibi_ref(NUM_HEADS2, ALIBI_DIM2)[:, :, :SEQ_LEN2, :SEQ_LEN2]
    assert out2.shape == (1, NUM_HEADS2, SEQ_LEN2, SEQ_LEN2), out2.shape
    assert out2.dtype == jnp.float32
    assert jnp.allclose(out2, ref2, atol=1e-6, rtol=1e-6)

    # forward() with S <= alibi_dim must not rebuild; padded cache is reused.
    out3 = jax.block_until_ready(module2.forward(128))
    assert out3.shape == (1, NUM_HEADS2, 128, 128)
    assert jnp.allclose(out3, alibi_ref(NUM_HEADS2, ALIBI_DIM2)[:, :, :128, :128])

    print("KERNEL_OK")
</pallas_src>

<mosaic_0001>
module attributes {stable_mosaic.version = 11 : i64} {
  func.func @_alibi_perhead_kernel(%arg0: i32, %arg1: memref<8xf32, #tpu.memory_space<smem>>, %arg2: memref<1x1x128x128xf32, #tpu.memory_space<vmem>>) attributes {dimension_semantics = [#tpu.dimension_semantics<parallel>], iteration_bounds = array<i64: 8>, scalar_prefetch = 0 : i64, scratch_operands = 0 : i64, tpu.core_type = #tpu.core_type<tc>, window_params = [{transform_indices = @transform_0, window_bounds = array<i64: 8>}, {transform_indices = @transform_1, window_bounds = array<i64: 1, 1, 128, 128>}]} {
    %0 = tpu.iota {dimensions = array<i32: 0>} : vector<128x128xi32>
    %1 = tpu.iota {dimensions = array<i32: 1>} : vector<128x128xi32>
    %2 = arith.subi %1, %0 : vector<128x128xi32>
    %3 = math.absi %2 : vector<128x128xi32>
    %4 = arith.sitofp %3 : vector<128x128xi32> to vector<128x128xf32>
    %cst = arith.constant 0.000000e+00 : f32
    %5 = vector.broadcast %cst : f32 to vector<128x128xf32>
    %6 = arith.subf %5, %4 : vector<128x128xf32>
    %7 = arith.index_cast %arg0 : i32 to index
    %8 = memref.load %arg1[%7] : memref<8xf32, #tpu.memory_space<smem>>
    %9 = vector.broadcast %8 : f32 to vector<128x128xf32>
    %10 = arith.mulf %9, %6 : vector<128x128xf32>
    %c0 = arith.constant 0 : index
    %c0_0 = arith.constant 0 : index
    %c0_1 = arith.constant 0 : index
    %c0_2 = arith.constant 0 : index
    %11 = vector.load %arg2[%c0, %c0_0, %c0_1, %c0_2] : memref<1x1x128x128xf32, #tpu.memory_space<vmem>>, vector<1x1x128x128xf32>
    %12 = vector.shape_cast %11 : vector<1x1x128x128xf32> to vector<128x128xf32>
    %13 = vector.shape_cast %10 : vector<128x128xf32> to vector<1x1x128x128xf32>
    tpu.vector_store %arg2[%c0, %c0_0, %c0_1, %c0_2], %13 {strides = array<i32>} : memref<1x1x128x128xf32, #tpu.memory_space<vmem>>, vector<1x1x128x128xf32>,
    return
  }
  func.func @transform_0(%arg0: i32) -> i32 {
    %c0_i32 = arith.constant 0 : i32
    %c0_i32_0 = arith.constant 0 : i32
    return %c0_i32 : i32
  }
  func.func @transform_1(%arg0: i32) -> (i32, i32, i32, i32) {
    %c0_i32 = arith.constant 0 : i32
    %c0_i32_0 = arith.constant 0 : i32
    %c0_i32_1 = arith.constant 0 : i32
    %c0_i32_2 = arith.constant 0 : i32
    return %c0_i32, %arg0, %c0_i32_0, %c0_i32_1 : i32, i32, i32, i32
  }
}

</mosaic_0001>

<bundles_post_ra>
// kernel: tpu_custom_call.1
= control target key start
LH: loop header
LB: loop body
LE: loop exit
PB: predicated region body
PF: predicated region fallthrough
CT: control target
= control target key end

     0   :  { %6 = vsyncpa [#allocation4], 0  ;;  %s710_s0 = inlined_call_operand.hbm [shape: f32[8], index: 0, kind: input, shape index: {}]   ;;  %s711_s1 = inlined_call_operand.hbm [shape: f32[1,8,128,128], index: 1, kind: output, shape index: {}]  }
   0x1   :  { %7 = vsyncpa [#allocation3], 0 }
   0x2   :  { %9 = vsyncpa [#allocation3 + $0x1], 0  ;;  %s507_s6 = smov 0   ;;  %s509_s7 = smov 0  }
   0x3   :  { %s511_s8 = smov 0   ;;  %s513_s9 = smov 0  }
   0x4 LB: > { %s528_s10 = sadd.s32 4294967295, %s491_s9   ;;  %s332_s11 = sadd.s32 4294967294, %s491_s9   ;;  %s491_s9 = sphi %s513_s9, %s718_s9   ;;  %s487_s8 = sphi %s511_s8, %s717_s8   ;;  %s483_s7 = sphi %s509_s7, %s716_s7   ;;  %s479_s6 = sphi %s507_s6, %s715_s6  }
   0x5   : > { %s532_s12 = sadd.s32 1, %s491_s9   ;;  %s43_s13 = sadd.s32 1, %s487_s8 }
   0x6   : > { %s40_s14 = ssub.s32 %s491_s9, %s532_s12  ;;  %p53_p0 = scmp.ne.s32.totalorder %s487_s8, %s483_s7 }
   0x7   : > { %p41_p1 = scmp.eq.s32.totalorder %s40_s14, 0  ;;  %p54_p2 = scmp.eq.s32.totalorder %s528_s10, 7 }
   0x8   : > { %p59_p3 = scmp.ne.s32.totalorder %s483_s7, %s479_s6  ;;  %p60_p4 = scmp.eq.s32.totalorder %s332_s11, 7 }
   0x9   : > { %s543_s15 = scalar_select %p41_p1, %s487_s8, %s43_s13  }
   0xa   : > { %p545_p5 = por %p54_p2, %p53_p0  ;;  %p549_p6 = por %p60_p4, %p59_p3 }
   0xb   : > { %p333_p7 = scmp.ge.s32.totalorder %s491_s9, 1  ;;  %p67_p8 = scmp.lt.s32.totalorder %s491_s9, 9 }
   0xc   : > { %p374_p10 = scmp.eq.s32.totalorder %s528_s10, 0  ;;  %s412_s21 = scalar_lea.hbm %s710_s0, 16 }
   0xd   : > { %p555_p9 = pnand %p333_p7, %p67_p8  ;;  %p413_p13 = scmp.ne.s32.totalorder %s710_s0, %s412_s21 }
   0xe   : > { %p419_p3 = scmp.lt.u32.totalorder %s412_s21, %s710_s0 }
   0xf   : > { %p366_p11 = pneg %p555_p9 }
  0x11   : > { %p367_p12 = pnand %p374_p10, %p366_p11 }
  0x13   : > { %p414_p0 = pneg %p367_p12 }
  0x15   : > { %p415_p1 = pnand %p414_p0, %p413_p13 }
  0x17   : > { %p416_p2 = pneg %p415_p1 }
  0x19   : > { %p421_p4 = pnand %p419_p3, %p416_p2 }
  0x1b   : > { %424 = shalt.err (!%p421_p4)
}
  0x1c   : > { %s493_s26 = smov [#allocation2]   ;;  %91 = sbr.rel (%p555_p9) target bundleno = 88 (0x58), region = 24 }
  0x1d   : > { %369 = dma.hbm_to_smem (!%p367_p12), %s710_s0, 16, %s493_s26, [#allocation4]  }
  0x23   : > { %470 = dma.done.wait (%p374_p10), [#allocation4], 16  }
  0x24   : > { %472 = vsyncadd (%p374_p10), [#allocation4], 4294967280 }
  0x25   : > { %97 = sfence }
  0x26   : > { %v107_v0 = vlaneseq  ;;  %s222_s29 = sld [smem:[#allocation2 + %s528_s10]]  ;;  %s104_s30 = sand.u32 1, %s483_s7  }
  0x27   : > { %s337_s2 = sshll.u32 %s104_s30, 7  ;;  %s359_s4 = sshll.u32 %s528_s10, 11 }
  0x28   : > { %v583_v1 = vshrl.u32 %v107_v0, 7  ;;  %v585_v2 = vand.u32 127, %v107_v0  ;;  %s609_s3 = scalar_lea.vmem [#allocation5], %s337_s2  ;;  %s655_s13 = scalar_lea.hbm %s711_s1, %s359_s4 }
  0x29   : > { %s270_s5 = sshll.u32 %s609_s3, 4  ;;  %s669_s14 = scalar_lea.sflag [#allocation3], %s104_s30  ;;  %s657_s5 = int_to_ptr.vmem [resolvable:$true] %s270_s5 }
  0x2a   : > { %v126_v3 = vsub.s32 %v585_v2, %v583_v1  ;;  %v109_v4 = vadd.s32 8, %v583_v1  ;;  %v110_v5 = vadd.s32 16, %v583_v1  ;;  %v111_v6 = vadd.s32 24, %v583_v1  ;;  %s425_s18 = scalar_lea.vmem %s657_s5, 2048  ;;  %s494_s19 = smov [#allocation5]  }
  0x2b   : > { %v112_v7 = vadd.s32 32, %v583_v1  ;;  %v113_v8 = vadd.s32 40, %v583_v1  ;;  %v114_v9 = vadd.s32 48, %v583_v1  ;;  %v115_v10 = vadd.s32 56, %v583_v1  ;;  %p426_p7 = scmp.ne.s32.totalorder %s657_s5, %s425_s18  ;;  %s429_s20 = sshll.u32 %s494_s19, 4  ;;  %s430_s20 = int_to_ptr.vmem [resolvable:$false] %s429_s20 }
  0x2c   : > { %v143_v11 = vsub.s32 0, %v126_v3  ;;  %v596_v12 = vstv %s222_s29  ;;  %v127_v13 = vsub.s32 %v585_v2, %v109_v4  ;;  %v128_v14 = vsub.s32 %v585_v2, %v110_v5  ;;  %s431_s21 = scalar_lea.vmem %s430_s20, 4096  ;;  %p432_p10 = scmp.lt.s32.totalorder %s657_s5, %s430_s20 }
  0x2d   : > { %v129_v15 = vsub.s32 %v585_v2, %v111_v6  ;;  %v130_v16 = vsub.s32 %v585_v2, %v112_v7  ;;  %v131_v17 = vsub.s32 %v585_v2, %v113_v8  ;;  %v132_v18 = vsub.s32 %v585_v2, %v114_v9  ;;  %p427_p8 = pnand %p426_p7, %p545_p5  ;;  %p433_p11 = scmp.lt.s32.totalorder %s431_s21, %s425_s18 }
  0x2e   : > { %v338_v19 = vmin.u32 %v143_v11, %v126_v3  ;;  %v146_v20 = vsub.s32 0, %v127_v13  ;;  %v149_v21 = vsub.s32 0, %v128_v14  ;;  %v133_v22 = vsub.s32 %v585_v2, %v115_v10 }
  0x2f   : > { %v152_v23 = vsub.s32 0, %v129_v15  ;;  %v155_v24 = vsub.s32 0, %v130_v16  ;;  %v158_v25 = vsub.s32 0, %v131_v17  ;;  %v161_v26 = vsub.s32 0, %v132_v18  ;;  %p428_p9 = pneg %p427_p8  ;;  %p434_p12 = por %p433_p11, %p432_p10 }
  0x30   : > { %v190_v27 = vcvt.s32.f32 %v338_v19  ;;  %v339_v28 = vmin.u32 %v146_v20, %v127_v13  ;;  %v340_v29 = vmin.u32 %v149_v21, %v128_v14  ;;  %v164_v30 = vsub.s32 0, %v133_v22 }
  0x31   : > { %v341_v31 = vmin.u32 %v152_v23, %v129_v15  ;;  %v342_v32 = vmin.u32 %v155_v24, %v130_v16  ;;  %v343_v33 = vmin.u32 %v158_v25, %v131_v17  ;;  %v344_v34 = vmin.u32 %v161_v26, %v132_v18  ;;  %p435_p13 = pnand %p434_p12, %p428_p9 }
  0x32   : > { %v206_v35 = vsub.f32 0.0, %v190_v27  ;;  %v191_v36 = vcvt.s32.f32 %v339_v28  ;;  %v192_v37 = vcvt.s32.f32 %v340_v29  ;;  %v345_v38 = vmin.u32 %v164_v30, %v133_v22 }
  0x33   : > { %v193_v39 = vcvt.s32.f32 %v341_v31  ;;  %v194_v40 = vcvt.s32.f32 %v342_v32  ;;  %v195_v41 = vcvt.s32.f32 %v343_v33  ;;  %v196_v42 = vcvt.s32.f32 %v344_v34 }
  0x34   : > { %v224_v43 = vmul.f32 %v596_v12, %v206_v35  ;;  %v207_v44 = vsub.f32 0.0, %v191_v36  ;;  %v208_v45 = vsub.f32 0.0, %v192_v37  ;;  %v197_v46 = vcvt.s32.f32 %v345_v38 }
  0x35   : > { %v209_v47 = vsub.f32 0.0, %v193_v39  ;;  %v210_v48 = vsub.f32 0.0, %v194_v40  ;;  %v211_v49 = vsub.f32 0.0, %v195_v41  ;;  %v212_v50 = vsub.f32 0.0, %v196_v42 }
  0x36   : > { %240 = vst [vmem:[%s609_s3] sm:$0xff] %v224_v43  ;;  %v225_v51 = vmul.f32 %v596_v12, %v207_v44  ;;  %v226_v52 = vmul.f32 %v596_v12, %v208_v45  ;;  %v213_v53 = vsub.f32 0.0, %v197_v46  ;;  %v116_v54 = vadd.s32 64, %v583_v1 }
  0x37   : > { %v227_v55 = vmul.f32 %v596_v12, %v209_v47  ;;  %v228_v56 = vmul.f32 %v596_v12, %v210_v48  ;;  %v229_v57 = vmul.f32 %v596_v12, %v211_v49  ;;  %v230_v58 = vmul.f32 %v596_v12, %v212_v50 }
  0x38   : > { %241 = vst [vmem:[%s609_s3 + $0x8] sm:$0xff] %v225_v51  ;;  %242 = vst [vmem:[%s609_s3 + $0x10] sm:$0xff] %v226_v52  ;;  %v231_v59 = vmul.f32 %v596_v12, %v213_v53  ;;  %v134_v60 = vsub.s32 %v585_v2, %v116_v54  ;;  %v117_v61 = vadd.s32 72, %v583_v1  ;;  %v118_v62 = vadd.s32 80, %v583_v1 }
  0x39   : > { %243 = vst [vmem:[%s609_s3 + $0x18] sm:$0xff] %v227_v55  ;;  %244 = vst [vmem:[%s609_s3 + $0x20] sm:$0xff] %v228_v56  ;;  %v119_v63 = vadd.s32 88, %v583_v1  ;;  %v120_v0 = vadd.s32 96, %v583_v1  ;;  %v121_v3 = vadd.s32 104, %v583_v1  ;;  %v122_v4 = vadd.s32 112, %v583_v1 }
  0x3a   : > { %245 = vst [vmem:[%s609_s3 + $0x28] sm:$0xff] %v229_v57  ;;  %246 = vst [vmem:[%s609_s3 + $0x30] sm:$0xff] %v230_v58  ;;  %v167_v5 = vsub.s32 0, %v134_v60  ;;  %v135_v6 = vsub.s32 %v585_v2, %v117_v61  ;;  %v136_v7 = vsub.s32 %v585_v2, %v118_v62  ;;  %v123_v8 = vadd.s32 120, %v583_v1 }
  0x3b   : > { %247 = vst [vmem:[%s609_s3 + $0x38] sm:$0xff] %v231_v59  ;;  %v137_v9 = vsub.s32 %v585_v2, %v119_v63  ;;  %v138_v10 = vsub.s32 %v585_v2, %v120_v0  ;;  %v139_v11 = vsub.s32 %v585_v2, %v121_v3  ;;  %v140_v13 = vsub.s32 %v585_v2, %v122_v4 }
  0x3c   : > { %v346_v14 = vmin.u32 %v167_v5, %v134_v60  ;;  %v170_v15 = vsub.s32 0, %v135_v6  ;;  %v173_v16 = vsub.s32 0, %v136_v7  ;;  %v141_v17 = vsub.s32 %v585_v2, %v123_v8 }
  0x3d   : > { %v176_v18 = vsub.s32 0, %v137_v9  ;;  %v179_v19 = vsub.s32 0, %v138_v10  ;;  %v182_v20 = vsub.s32 0, %v139_v11  ;;  %v185_v21 = vsub.s32 0, %v140_v13 }
  0x3e   : > { %v198_v22 = vcvt.s32.f32 %v346_v14  ;;  %v347_v23 = vmin.u32 %v170_v15, %v135_v6  ;;  %v348_v1 = vmin.u32 %v173_v16, %v136_v7  ;;  %v188_v24 = vsub.s32 0, %v141_v17 }
  0x3f   : > { %v349_v25 = vmin.u32 %v176_v18, %v137_v9  ;;  %v350_v26 = vmin.u32 %v179_v19, %v138_v10  ;;  %v351_v27 = vmin.u32 %v182_v20, %v139_v11  ;;  %v352_v28 = vmin.u32 %v185_v21, %v140_v13 }
  0x40   : > { %v214_v29 = vsub.f32 0.0, %v198_v22  ;;  %v199_v30 = vcvt.s32.f32 %v347_v23  ;;  %v200_v31 = vcvt.s32.f32 %v348_v1  ;;  %v353_v32 = vmin.u32 %v188_v24, %v141_v17 }
  0x41   : > { %v201_v2 = vcvt.s32.f32 %v349_v25  ;;  %v202_v33 = vcvt.s32.f32 %v350_v26  ;;  %v203_v34 = vcvt.s32.f32 %v351_v27  ;;  %v204_v35 = vcvt.s32.f32 %v352_v28 }
  0x42   : > { %v232_v36 = vmul.f32 %v596_v12, %v214_v29  ;;  %v215_v37 = vsub.f32 0.0, %v199_v30  ;;  %v216_v38 = vsub.f32 0.0, %v200_v31  ;;  %v205_v39 = vcvt.s32.f32 %v353_v32 }
  0x43   : > { %v217_v40 = vsub.f32 0.0, %v201_v2  ;;  %v218_v41 = vsub.f32 0.0, %v202_v33  ;;  %v219_v42 = vsub.f32 0.0, %v203_v34  ;;  %v220_v43 = vsub.f32 0.0, %v204_v35 }
  0x44   : > { %248 = vst [vmem:[%s609_s3 + $0x40] sm:$0xff] %v232_v36  ;;  %v233_v44 = vmul.f32 %v596_v12, %v215_v37  ;;  %v234_v45 = vmul.f32 %v596_v12, %v216_v38  ;;  %v221_v46 = vsub.f32 0.0, %v205_v39 }
  0x45   : > { %v235_v47 = vmul.f32 %v596_v12, %v217_v40  ;;  %v236_v48 = vmul.f32 %v596_v12, %v218_v41  ;;  %v237_v49 = vmul.f32 %v596_v12, %v219_v42  ;;  %v238_v50 = vmul.f32 %v596_v12, %v220_v43 }
  0x46   : > { %249 = vst [vmem:[%s609_s3 + $0x48] sm:$0xff] %v233_v44  ;;  %250 = vst [vmem:[%s609_s3 + $0x50] sm:$0xff] %v234_v45  ;;  %v239_v51 = vmul.f32 %v596_v12, %v221_v46 }
  0x47   : > { %251 = vst [vmem:[%s609_s3 + $0x58] sm:$0xff] %v235_v47  ;;  %252 = vst [vmem:[%s609_s3 + $0x60] sm:$0xff] %v236_v48 }
  0x48   : > { %253 = vst [vmem:[%s609_s3 + $0x68] sm:$0xff] %v237_v49  ;;  %254 = vst [vmem:[%s609_s3 + $0x70] sm:$0xff] %v238_v50 }
  0x49   : > { %255 = vst [vmem:[%s609_s3 + $0x78] sm:$0xff] %v239_v51 }
  0x4a   : > { %438 = shalt.err (!%p435_p13)
}
  0x4b   : > { %s439_s22 = scalar_lea.hbm %s655_s13, 2048  ;;  %s443_s25 = scalar_lea.hbm %s711_s1, 16384 }
  0x4c   : > { %p440_p0 = scmp.ne.s32.totalorder %s655_s13, %s439_s22  ;;  %p444_p3 = scmp.lt.u32.totalorder %s655_s13, %s711_s1 }
  0x4d   : > { %p445_p4 = scmp.lt.u32.totalorder %s443_s25, %s439_s22  ;;  %p447_p8 = scmp.lt.u32.totalorder %s439_s22, %s655_s13 }
  0x4e   : > { %p441_p1 = pnand %p440_p0, %p545_p5 }
  0x4f   : > { %p446_p7 = por %p445_p4, %p444_p3 }
  0x50   : > { %p442_p2 = pneg %p441_p1 }
  0x51   : > { %p448_p9 = por %p447_p8, %p446_p7 }
  0x53   : > { %p449_p10 = pnand %p448_p9, %p442_p2 }
  0x55   : > { %452 = shalt.err (!%p449_p10)
}
  0x56   : > { %s495_s28 = smov 128   ;;  %s496_s29 = smov 8  }
  0x57   : > { %364 = dma.vmem_to_hbm [thread:$0]  (%p545_p5), %s657_s5, 2048, %s655_s13, %s669_s14, %s495_s28, %s495_s28, %s496_s29  }
  0x58 PF: > { %p376_p11 = scmp.ge.s32.totalorder %s491_s9, 2  ;;  %s285_s30 = sand.u32 1, %s479_s6  }
  0x59   : > { %s286_s2 = scalar_lea.sflag [#allocation3], %s285_s30 }
  0x5a   : > { %p371_p12 = pnand %p376_p11, %p549_p6 }
  0x5c   : > { %474 = dma.done.wait (!%p371_p12), %s286_s2, 2048  }
  0x5d   : > { %476 = vsyncadd (!%p371_p12), %s286_s2, 4294965248  ;;  %p12_p13 = scmp.ge.s32.totalorder %s532_s12, 10   ;;  %s715_s6 = smov %s483_s7 }
  0x5e   : > { %s716_s7 = smov %s487_s8  ;;  %s717_s8 = smov %s543_s15 }
  0x5f   : > { %s718_s9 = smov %s532_s12  ;;  %14 = sbr.rel (!%p12_p13) target bundleno = 4 (0x4), region = 61 }
  0x66   :  { %291 = vsyncpa [#allocation3], 1 }
  0x67   :  { %293 = vsyncpa [#allocation3 + $0x1], 1 }
  0x68   :  { %294 = vsyncpa [#allocation4], 1 }
  0x69   :  { %296 = vsyncpa [#allocation4 + $0x1], 1 }

</bundles_post_ra>
